<compile_context>
chip_gen: v6e
topology: v6e:2x2x1
jax: 0.10.0
libtpu: 0.0.40
codegen_flags: <defaults>
</compile_context>

<pallas_src>
import jax
import jax.numpy as jnp
from jax.experimental import pallas as pl
from jax.experimental.pallas import tpu as pltpu

INPUT_DIM = 32                      # small synthetic input_dim
H1, H2, H3, OUT = 128, 64, 16, 2    # layer widths from the PyTorch module
LANE = 128                          # TPU lane width; hidden layers padded to this
DEF_TILE_B = 2048                   # batch tile (multiple of 128); ~4-5 MB VMEM


def _mlp_kernel(x_ref, w1_ref, b1_ref, w2_ref, b2_ref, w3_ref, b3_ref,
                w4_ref, b4_ref, o_ref):
    # Cast f32 activations to bf16 on-chip (VPU pack hides under the MXU).
    x = x_ref[...].astype(jnp.bfloat16)
    # fc1 + relu  (bf16 x bf16 -> f32 accumulate on the MXU)
    h = jnp.dot(x, w1_ref[...], preferred_element_type=jnp.float32)
    h = jnp.maximum(h + b1_ref[...], 0.0)
    # dropout(p=0.3) -> identity at inference
    # fc2 + relu  (hidden padded to 128 lanes; padded cols stay exactly 0)
    h = jnp.dot(h.astype(jnp.bfloat16), w2_ref[...],
                preferred_element_type=jnp.float32)
    h = jnp.maximum(h + b2_ref[...], 0.0)
    # fc3 + relu
    h = jnp.dot(h.astype(jnp.bfloat16), w3_ref[...],
                preferred_element_type=jnp.float32)
    h = jnp.maximum(h + b3_ref[...], 0.0)
    # fc4: w4 is (128, OUT) -> logits only, stored directly (no padded slab)
    logits = jnp.dot(h.astype(jnp.bfloat16), w4_ref[...],
                     preferred_element_type=jnp.float32)
    o_ref[...] = (logits + b4_ref[...]).astype(o_ref.dtype)


def _round_up(n, m):
    return ((n + m - 1) // m) * m


def _pad_to(a, shape):
    return jnp.pad(a, [(0, t - s) for s, t in zip(a.shape, shape)])


def pack_params(params):
    """Zero-pad hidden layers to 128 lanes; weights -> bf16, biases -> f32.

    w4 is padded only along its input dim (16 -> 128) so the kernel output is
    exactly (batch, OUT).
    """
    w1 = params["w1"].astype(jnp.bfloat16)                           # (32, 128)
    w2 = _pad_to(params["w2"], (H1, LANE)).astype(jnp.bfloat16)      # (128, 128)
    w3 = _pad_to(params["w3"], (LANE, LANE)).astype(jnp.bfloat16)    # (128, 128)
    w4 = _pad_to(params["w4"], (LANE, OUT)).astype(jnp.bfloat16)     # (128, 2)
    b1 = params["b1"].astype(jnp.float32)                            # (1, 128)
    b2 = _pad_to(params["b2"], (1, LANE)).astype(jnp.float32)        # (1, 128)
    b3 = _pad_to(params["b3"], (1, LANE)).astype(jnp.float32)        # (1, 128)
    b4 = params["b4"].astype(jnp.float32)                            # (1, 2)
    return (w1, b1, w2, b2, w3, b3, w4, b4)


def _choose_tiling(batch, max_tile=DEF_TILE_B):
    """Return (padded_batch, tile_b) with tile_b | padded_batch, waste <= 127 rows."""
    pb = _round_up(batch, 8)
    if pb <= max_tile:
        # Small batch: fits one tile. Split in two if there's enough work so
        # v7x's two TensorCores can both run a grid step.
        if pb >= 512 and pb % 16 == 0:
            return pb, pb // 2
        return pb, pb
    # Large batch: pad only to a multiple of 128, then pick the largest
    # 128-multiple tile <= max_tile that divides the padded batch.
    pb = _round_up(batch, 128)
    for cand in range(max_tile, 0, -128):
        if pb % cand == 0:
            return pb, cand
    return pb, 128  # unreachable (128 always divides pb)


def classification_model_forward(x, params, *, max_tile_b=DEF_TILE_B):
    """x: [batch, INPUT_DIM] float32. params: dict of unpadded weights/biases."""
    batch = x.shape[0]
    padded_batch, tile_b = _choose_tiling(batch, max_tile_b)

    xp = x
    if padded_batch != batch:
        xp = jnp.pad(xp, ((0, padded_batch - batch), (0, 0)))
    packed = pack_params(params)

    grid = (padded_batch // tile_b,)
    x_spec = pl.BlockSpec((tile_b, INPUT_DIM), lambda i: (i, 0))
    out_spec = pl.BlockSpec((tile_b, OUT), lambda i: (i, 0))
    # Weights/biases: whole-array blocks with a constant index_map -> stay
    # resident in VMEM across all grid steps (no re-DMA).
    w_specs = [pl.BlockSpec(p.shape, lambda i: (0, 0)) for p in packed]

    flops = 2 * padded_batch * (INPUT_DIM * H1 + H1 * LANE + LANE * LANE
                                + LANE * OUT)
    weight_bytes = sum(int(p.size) * p.dtype.itemsize for p in packed)
    bytes_accessed = (padded_batch * INPUT_DIM * 4     # f32 x read
                      + padded_batch * OUT * 4         # f32 logits write
                      + weight_bytes)

    out = pl.pallas_call(
        _mlp_kernel,
        out_shape=jax.ShapeDtypeStruct((padded_batch, OUT), jnp.float32),
        grid=grid,
        in_specs=[x_spec] + w_specs,
        out_specs=out_spec,
        compiler_params=pltpu.CompilerParams(
            dimension_semantics=("parallel",)),
        cost_estimate=pl.CostEstimate(
            flops=flops, transcendentals=0, bytes_accessed=bytes_accessed),
    )(xp, *packed)

    if padded_batch != batch:
        out = out[:batch]
    return out


def init_params(key, input_dim=INPUT_DIM):
    """Deterministic synthetic parameters (PyTorch-like uniform fan-in init).

    Stored transposed vs. nn.Linear, i.e. (in_dim, out_dim), so each layer is
    a plain `x @ W + b`.
    """
    dims = [(input_dim, H1), (H1, H2), (H2, H3), (H3, OUT)]
    params = {}
    for i, (fan_in, fan_out) in enumerate(dims, start=1):
        key, kw, kb = jax.random.split(key, 3)
        bound = 1.0 / jnp.sqrt(fan_in)
        params[f"w{i}"] = jax.random.uniform(
            kw, (fan_in, fan_out), jnp.float32, -bound, bound)
        params[f"b{i}"] = jax.random.uniform(
            kb, (1, fan_out), jnp.float32, -bound, bound)
    return params


def reference_forward(x, params):
    """Pure-JAX reference mirroring the kernel's bf16-input / f32-accum math."""
    def dot(a, w):
        return jnp.dot(a.astype(jnp.bfloat16), w.astype(jnp.bfloat16),
                       preferred_element_type=jnp.float32)
    h = jnp.maximum(dot(x, params["w1"]) + params["b1"], 0.0)
    h = jnp.maximum(dot(h, params["w2"]) + params["b2"], 0.0)
    h = jnp.maximum(dot(h, params["w3"]) + params["b3"], 0.0)
    return dot(h, params["w4"]) + params["b4"]


if __name__ == "__main__":
    key = jax.random.PRNGKey(0)
    key, kx = jax.random.split(key)
    batch = 8
    x = jax.random.normal(kx, (batch, INPUT_DIM), jnp.float32)
    params = init_params(key, INPUT_DIM)

    out = classification_model_forward(x, params)
    out = jax.block_until_ready(out)

    ref = reference_forward(x, params)
    assert out.shape == (batch, OUT), out.shape
    assert jnp.allclose(out, ref, atol=2e-2, rtol=2e-2), (
        f"max abs err = {jnp.max(jnp.abs(out - ref))}")
    print("KERNEL_OK")
</pallas_src>

<mosaic_0001>
module attributes {stable_mosaic.version = 11 : i64} {
  func.func @_mlp_kernel(%arg0: i32, %arg1: memref<8x32xf32, #tpu.memory_space<vmem>>, %arg2: memref<32x128xbf16, #tpu.memory_space<vmem>>, %arg3: memref<1x128xf32, #tpu.memory_space<vmem>>, %arg4: memref<128x128xbf16, #tpu.memory_space<vmem>>, %arg5: memref<1x128xf32, #tpu.memory_space<vmem>>, %arg6: memref<128x128xbf16, #tpu.memory_space<vmem>>, %arg7: memref<1x128xf32, #tpu.memory_space<vmem>>, %arg8: memref<128x2xbf16, #tpu.memory_space<vmem>>, %arg9: memref<1x2xf32, #tpu.memory_space<vmem>>, %arg10: memref<8x2xf32, #tpu.memory_space<vmem>>) attributes {dimension_semantics = [#tpu.dimension_semantics<parallel>], iteration_bounds = array<i64: 1>, scalar_prefetch = 0 : i64, scratch_operands = 0 : i64, tpu.core_type = #tpu.core_type<tc>, window_params = [{transform_indices = @transform_0, window_bounds = array<i64: 8, 32>}, {pipeline_mode = #tpu.pipeline_mode<synchronous>, transform_indices = @transform_1, window_bounds = array<i64: 32, 128>}, {pipeline_mode = #tpu.pipeline_mode<synchronous>, transform_indices = @transform_2, window_bounds = array<i64: 1, 128>}, {pipeline_mode = #tpu.pipeline_mode<synchronous>, transform_indices = @transform_3, window_bounds = array<i64: 128, 128>}, {pipeline_mode = #tpu.pipeline_mode<synchronous>, transform_indices = @transform_4, window_bounds = array<i64: 1, 128>}, {pipeline_mode = #tpu.pipeline_mode<synchronous>, transform_indices = @transform_5, window_bounds = array<i64: 128, 128>}, {pipeline_mode = #tpu.pipeline_mode<synchronous>, transform_indices = @transform_6, window_bounds = array<i64: 1, 128>}, {pipeline_mode = #tpu.pipeline_mode<synchronous>, transform_indices = @transform_7, window_bounds = array<i64: 128, 2>}, {pipeline_mode = #tpu.pipeline_mode<synchronous>, transform_indices = @transform_8, window_bounds = array<i64: 1, 2>}, {transform_indices = @transform_9, window_bounds = array<i64: 8, 2>}]} {
    %c0 = arith.constant 0 : index
    %c0_0 = arith.constant 0 : index
    %0 = vector.load %arg1[%c0, %c0_0] : memref<8x32xf32, #tpu.memory_space<vmem>>, vector<8x32xf32>
    %1 = arith.truncf %0 : vector<8x32xf32> to vector<8x32xbf16>
    %c0_1 = arith.constant 0 : index
    %c0_2 = arith.constant 0 : index
    %2 = vector.load %arg2[%c0_1, %c0_2] : memref<32x128xbf16, #tpu.memory_space<vmem>>, vector<32x128xbf16>
    %cst = arith.constant dense<0.000000e+00> : vector<8x128xf32>
    %3 = tpu.matmul %1, %2, %cst {dimension_numbers = #tpu.dot_dimension_numbers<[1], [0], [0], [1], [0, 0, 1, 1], [], []>} : vector<8x32xbf16>, vector<32x128xbf16>, vector<8x128xf32> -> vector<8x128xf32>
    %c0_3 = arith.constant 0 : index
    %c0_4 = arith.constant 0 : index
    %4 = vector.load %arg3[%c0_3, %c0_4] : memref<1x128xf32, #tpu.memory_space<vmem>>, vector<1x128xf32>
    %5 = vector.broadcast %4 : vector<1x128xf32> to vector<8x128xf32>
    %6 = arith.addf %3, %5 : vector<8x128xf32>
    %cst_5 = arith.constant 0.000000e+00 : f32
    %7 = vector.broadcast %cst_5 : f32 to vector<8x128xf32>
    %8 = arith.maximumf %6, %7 : vector<8x128xf32>
    %9 = arith.truncf %8 : vector<8x128xf32> to vector<8x128xbf16>
    %c0_6 = arith.constant 0 : index
    %c0_7 = arith.constant 0 : index
    %10 = vector.load %arg4[%c0_6, %c0_7] : memref<128x128xbf16, #tpu.memory_space<vmem>>, vector<128x128xbf16>
    %cst_8 = arith.constant dense<0.000000e+00> : vector<8x128xf32>
    %11 = tpu.matmul %9, %10, %cst_8 {dimension_numbers = #tpu.dot_dimension_numbers<[1], [0], [0], [1], [0, 0, 1, 1], [], []>} : vector<8x128xbf16>, vector<128x128xbf16>, vector<8x128xf32> -> vector<8x128xf32>
    %c0_9 = arith.constant 0 : index
    %c0_10 = arith.constant 0 : index
    %12 = vector.load %arg5[%c0_9, %c0_10] : memref<1x128xf32, #tpu.memory_space<vmem>>, vector<1x128xf32>
    %13 = vector.broadcast %12 : vector<1x128xf32> to vector<8x128xf32>
    %14 = arith.addf %11, %13 : vector<8x128xf32>
    %cst_11 = arith.constant 0.000000e+00 : f32
    %15 = vector.broadcast %cst_11 : f32 to vector<8x128xf32>
    %16 = arith.maximumf %14, %15 : vector<8x128xf32>
    %17 = arith.truncf %16 : vector<8x128xf32> to vector<8x128xbf16>
    %c0_12 = arith.constant 0 : index
    %c0_13 = arith.constant 0 : index
    %18 = vector.load %arg6[%c0_12, %c0_13] : memref<128x128xbf16, #tpu.memory_space<vmem>>, vector<128x128xbf16>
    %cst_14 = arith.constant dense<0.000000e+00> : vector<8x128xf32>
    %19 = tpu.matmul %17, %18, %cst_14 {dimension_numbers = #tpu.dot_dimension_numbers<[1], [0], [0], [1], [0, 0, 1, 1], [], []>} : vector<8x128xbf16>, vector<128x128xbf16>, vector<8x128xf32> -> vector<8x128xf32>
    %c0_15 = arith.constant 0 : index
    %c0_16 = arith.constant 0 : index
    %20 = vector.load %arg7[%c0_15, %c0_16] : memref<1x128xf32, #tpu.memory_space<vmem>>, vector<1x128xf32>
    %21 = vector.broadcast %20 : vector<1x128xf32> to vector<8x128xf32>
    %22 = arith.addf %19, %21 : vector<8x128xf32>
    %cst_17 = arith.constant 0.000000e+00 : f32
    %23 = vector.broadcast %cst_17 : f32 to vector<8x128xf32>
    %24 = arith.maximumf %22, %23 : vector<8x128xf32>
    %25 = arith.truncf %24 : vector<8x128xf32> to vector<8x128xbf16>
    %c0_18 = arith.constant 0 : index
    %c0_19 = arith.constant 0 : index
    %26 = vector.load %arg8[%c0_18, %c0_19] : memref<128x2xbf16, #tpu.memory_space<vmem>>, vector<128x2xbf16>
    %cst_20 = arith.constant dense<0.000000e+00> : vector<8x2xf32>
    %27 = tpu.matmul %25, %26, %cst_20 {dimension_numbers = #tpu.dot_dimension_numbers<[1], [0], [0], [1], [0, 0, 1, 1], [], []>} : vector<8x128xbf16>, vector<128x2xbf16>, vector<8x2xf32> -> vector<8x2xf32>
    %c0_21 = arith.constant 0 : index
    %c0_22 = arith.constant 0 : index
    %28 = vector.load %arg9[%c0_21, %c0_22] : memref<1x2xf32, #tpu.memory_space<vmem>>, vector<1x2xf32>
    %29 = vector.broadcast %28 : vector<1x2xf32> to vector<8x2xf32>
    %30 = arith.addf %27, %29 : vector<8x2xf32>
    %c0_23 = arith.constant 0 : index
    %c0_24 = arith.constant 0 : index
    %31 = vector.load %arg10[%c0_23, %c0_24] : memref<8x2xf32, #tpu.memory_space<vmem>>, vector<8x2xf32>
    tpu.vector_store %arg10[%c0_23, %c0_24], %30 {strides = array<i32>} : memref<8x2xf32, #tpu.memory_space<vmem>>, vector<8x2xf32>,
    return
  }
  func.func @transform_0(%arg0: i32) -> (i32, i32) {
    %c0_i32 = arith.constant 0 : i32
    %c0_i32_0 = arith.constant 0 : i32
    return %arg0, %c0_i32 : i32, i32
  }
  func.func @transform_1(%arg0: i32) -> (i32, i32) {
    %c0_i32 = arith.constant 0 : i32
    %c0_i32_0 = arith.constant 0 : i32
    %c0_i32_1 = arith.constant 0 : i32
    return %c0_i32, %c0_i32_0 : i32, i32
  }
  func.func @transform_2(%arg0: i32) -> (i32, i32) {
    %c0_i32 = arith.constant 0 : i32
    %c0_i32_0 = arith.constant 0 : i32
    %c0_i32_1 = arith.constant 0 : i32
    return %c0_i32, %c0_i32_0 : i32, i32
  }
  func.func @transform_3(%arg0: i32) -> (i32, i32) {
    %c0_i32 = arith.constant 0 : i32
    %c0_i32_0 = arith.constant 0 : i32
    %c0_i32_1 = arith.constant 0 : i32
    return %c0_i32, %c0_i32_0 : i32, i32
  }
  func.func @transform_4(%arg0: i32) -> (i32, i32) {
    %c0_i32 = arith.constant 0 : i32
    %c0_i32_0 = arith.constant 0 : i32
    %c0_i32_1 = arith.constant 0 : i32
    return %c0_i32, %c0_i32_0 : i32, i32
  }
  func.func @transform_5(%arg0: i32) -> (i32, i32) {
    %c0_i32 = arith.constant 0 : i32
    %c0_i32_0 = arith.constant 0 : i32
    %c0_i32_1 = arith.constant 0 : i32
    return %c0_i32, %c0_i32_0 : i32, i32
  }
  func.func @transform_6(%arg0: i32) -> (i32, i32) {
    %c0_i32 = arith.constant 0 : i32
    %c0_i32_0 = arith.constant 0 : i32
    %c0_i32_1 = arith.constant 0 : i32
    return %c0_i32, %c0_i32_0 : i32, i32
  }
  func.func @transform_7(%arg0: i32) -> (i32, i32) {
    %c0_i32 = arith.constant 0 : i32
    %c0_i32_0 = arith.constant 0 : i32
    %c0_i32_1 = arith.constant 0 : i32
    return %c0_i32, %c0_i32_0 : i32, i32
  }
  func.func @transform_8(%arg0: i32) -> (i32, i32) {
    %c0_i32 = arith.constant 0 : i32
    %c0_i32_0 = arith.constant 0 : i32
    %c0_i32_1 = arith.constant 0 : i32
    return %c0_i32, %c0_i32_0 : i32, i32
  }
  func.func @transform_9(%arg0: i32) -> (i32, i32) {
    %c0_i32 = arith.constant 0 : i32
    %c0_i32_0 = arith.constant 0 : i32
    return %arg0, %c0_i32 : i32, i32
  }
}

</mosaic_0001>

<bundles_post_ra>
// kernel: tpu_custom_call.1
= control target key start
LH: loop header
LB: loop body
LE: loop exit
PB: predicated region body
PF: predicated region fallthrough
CT: control target
= control target key end

     0   :  { %14 = vsyncpa [#allocation3], 0  ;;  %s877_s0 = inlined_call_operand.hbm [shape: f32[8,32], index: 0, kind: input, shape index: {}]   ;;  %s878_s1 = inlined_call_operand.hbm [shape: bf16[32,128], index: 1, kind: input, shape index: {}]   ;;  %s879_s2 = inlined_call_operand.vmem [shape: f32[1,128], index: 2, kind: input, shape index: {}]   ;;  %s880_s3 = inlined_call_operand.vmem [shape: bf16[128,128], index: 3, kind: input, shape index: {}]   ;;  %s881_s4 = inlined_call_operand.vmem [shape: f32[1,128], index: 4, kind: input, shape index: {}]   ;;  %s882_s5 = inlined_call_operand.hbm [shape: bf16[128,128], index: 5, kind: input, shape index: {}]   ;;  %s883_s6 = inlined_call_operand.vmem [shape: f32[1,128], index: 6, kind: input, shape index: {}]   ;;  %s884_s7 = inlined_call_operand.vmem [shape: bf16[128,2], index: 7, kind: input, shape index: {}]   ;;  %s885_s8 = inlined_call_operand.vmem [shape: f32[1,2], index: 8, kind: input, shape index: {}]   ;;  %s886_s9 = inlined_call_operand.vmem [shape: f32[8,2], index: 9, kind: output, shape index: {}]  }
   0x1   :  { %15 = vsyncpa [#allocation5], 0  ;;  %s714_s30 = smov [#allocation4]  }
   0x2   :  { %s31_s10 = sshll.u32 %s714_s30, 4  ;;  %s32_s10 = int_to_ptr.vmem [resolvable:$true] %s31_s10 }
   0x3   :  { %s658_s11 = scalar_lea.vmem %s32_s10, 256  ;;  %p663_p1 = scmp.lt.s32.totalorder %s32_s10, %s32_s10 }
   0x4   :  { %p659_p0 = scmp.ne.s32.totalorder %s32_s10, %s658_s11  ;;  %p664_p2 = scmp.lt.s32.totalorder %s658_s11, %s658_s11 }
   0x6   :  { %p665_p3 = por %p664_p2, %p663_p1 }
   0x8   :  { %p666_p4 = pnand %p665_p3, %p659_p0 }
   0xa   :  { %669 = shalt.err (!%p666_p4)
}
   0xb   :  { %s715_s12 = smov 64   ;;  %s716_s13 = smov 4  }
   0xc   :  { %37 = dma.hbm_to_vmem [thread:$0]  %s878_s1, 256, %s32_s10, [#allocation5], %s715_s12, %s715_s12, %s716_s13  }
   0xd   :  { %s717_s16 = smov [#allocation2]   ;;  %s718_s18 = smov [#allocation6]  }
   0xe   :  { %s22_s17 = sshll.u32 %s717_s16, 4  ;;  %s49_s19 = sshll.u32 %s718_s18, 4  ;;  %s23_s17 = int_to_ptr.vmem [resolvable:$true] %s22_s17  ;;  %s50_s19 = int_to_ptr.vmem [resolvable:$true] %s49_s19 }
   0xf   :  { %s678_s20 = scalar_lea.vmem %s23_s17, 128  ;;  %p683_p6 = scmp.lt.s32.totalorder %s23_s17, %s23_s17 }
  0x10   :  { %p679_p5 = scmp.ne.s32.totalorder %s23_s17, %s678_s20  ;;  %p684_p7 = scmp.lt.s32.totalorder %s678_s20, %s678_s20 }
  0x12   :  { %p685_p8 = por %p684_p7, %p683_p6 }
  0x14   :  { %p686_p9 = pnand %p685_p8, %p679_p5 }
  0x16   :  { %689 = shalt.err (!%p686_p9)
}
  0x17   :  { %25 = dma.hbm_to_vmem [thread:$0]  %s877_s0, 128, %s23_s17, [#allocation3]  }
  0x18   :  { %s698_s23 = scalar_lea.vmem %s50_s19, 1024  ;;  %p703_p11 = scmp.lt.s32.totalorder %s50_s19, %s50_s19 }
  0x19   :  { %p699_p10 = scmp.ne.s32.totalorder %s50_s19, %s698_s23  ;;  %p704_p12 = scmp.lt.s32.totalorder %s698_s23, %s698_s23 }
  0x1b   :  { %p705_p13 = por %p704_p12, %p703_p11 }
  0x1d   :  { %p706_p0 = pnand %p705_p13, %p699_p10 }
  0x1f   :  { %709 = shalt.err (!%p706_p0)
}
  0x20   :  { %55 = dma.hbm_to_vmem [thread:$0]  %s882_s5, 1024, %s50_s19, [#allocation5], %s715_s12, %s715_s12, %s716_s13  }
  0x21   :  { %710 = dma.done.wait [#allocation3], 128  }
  0x22   :  { %711 = vsyncadd [#allocation3], 4294967168 }
  0x23   :  { %712 = dma.done.wait [#allocation5], 1280  }
  0x24   :  { %713 = vsyncadd [#allocation5], 4294966016  ;;  %v719_v0 = vmov 0.0   ;;  %vm720_vm0 = vmmov 0   ;;  %v624_v1 = vld [vmem:[#allocation4 + $0x8] sm:$0xff]   ;;  %v625_v2 = vld [vmem:[#allocation4] sm:$0xff]  }
  0x25   :  { %549 = vmatprep.subr.bf16.mxu0 %v719_v0  ;;  %553 = vmatprep.mubr.msk.bf16.mxu0 %vm720_vm0, %v719_v0  ;;  %v72_v3 = vld [vmem:[#allocation2] sm:$0xff]  ;;  %v626_v4 = vld [vmem:[%s880_s3 + $0x38] sm:$0xff]   ;;  %v627_v6 = vld [vmem:[%s880_s3 + $0x30] sm:$0xff]   ;;  %vm97_vm1 = vcmask 261120   ;;  %vm480_vm2 = vcmask 15360  }
  0x26   :  { %557 = vmatprep.subr.bf16.mxu1 %v719_v0  ;;  %573 = vmatprep.mubr.msk.bf16.mxu1 %vm720_vm0, %v719_v0  ;;  %v73_v5 = vpack.c.bf16 %v72_v3, %v72_v3  ;;  %v628_v7 = vld [vmem:[%s880_s3 + $0x28] sm:$0xff]   ;;  %v629_v8 = vld [vmem:[%s880_s3 + $0x20] sm:$0xff]   ;;  %v630_v9 = vld [vmem:[%s880_s3 + $0x18] sm:$0xff]  }
  0x27   :  { %550 = vmatpush3.bf16.msra.mxu0 %v624_v1  ;;  %558 = vmatpush3.bf16.msra.mxu1 %v626_v4  ;;  %v631_v10 = vld [vmem:[%s880_s3 + $0x10] sm:$0xff]   ;;  %v632_v11 = vld [vmem:[%s880_s3 + $0x8] sm:$0xff]   ;;  %v633_v12 = vld [vmem:[%s880_s3] sm:$0xff]  }
  0x28   :  { %551 = vmatprep.subr.bf16.mxu0 %v719_v0  ;;  %559 = vmatprep.subr.bf16.mxu1 %v719_v0  ;;  %v634_v13 = vld [vmem:[#allocation6 + $0x38] sm:$0xff]   ;;  %v635_v14 = vld [vmem:[#allocation6 + $0x30] sm:$0xff]   ;;  %v636_v15 = vld [vmem:[#allocation6 + $0x28] sm:$0xff]  }
  0x29   :  { %v637_v16 = vld [vmem:[#allocation6 + $0x20] sm:$0xff]   ;;  %v638_v17 = vld [vmem:[#allocation6 + $0x18] sm:$0xff]   ;;  %v639_v18 = vld [vmem:[#allocation6 + $0x10] sm:$0xff]  }
  0x2a   :  { %v488_v19 = vld [vmem:[%s879_s2] ss:$0 sm:$0xff]  ;;  %v641_v28 = vld [vmem:[#allocation6] sm:$0xff]   ;;  %v643_v30 = vld [vmem:[%s884_s7 + $0x30] sm:$0xff]  }
  0x2b   :  { %552 = vmatpush3.bf16.msra.mxu0 %v625_v2  ;;  %560 = vmatpush3.bf16.msra.mxu1 %v627_v6  ;;  %v640_v27 = vld [vmem:[#allocation6 + $0x8] sm:$0xff]   ;;  %v642_v29 = vld [vmem:[%s884_s7 + $0x38] sm:$0xff]   ;;  %v644_v31 = vld [vmem:[%s884_s7 + $0x28] sm:$0xff]  }
  0x2c   :  { %577 = vmatprep.subr.bf16.mxu0 %v719_v0  ;;  %561 = vmatprep.subr.bf16.mxu1 %v719_v0  ;;  %v645_v32 = vld [vmem:[%s884_s7 + $0x20] sm:$0xff]   ;;  %v646_v33 = vld [vmem:[%s884_s7 + $0x18] sm:$0xff]   ;;  %v647_v34 = vld [vmem:[%s884_s7 + $0x10] sm:$0xff]  }
  0x2d   :  { %v492_v35 = vld [vmem:[%s881_s4] ss:$0 sm:$0xff]  ;;  %v648_v43 = vld [vmem:[%s884_s7 + $0x8] sm:$0xff]  }
  0x2e   :  { %554 = vmatmul.mubr.msk.bf16.vlgmr.msra.gmra.mxu0 %vm97_vm1, %v73_v5  ;;  %v649_v44 = vld [vmem:[%s884_s7] sm:$0xff]  }
  0x2f   :  { %593 = vmatprep.mubr.msk.bf16.mxu0 %vm720_vm0, %v719_v0  ;;  %562 = vmatpush3.bf16.msra.mxu1 %v628_v7  ;;  %v501_v45 = vld [vmem:[%s883_s6] ss:$0 sm:$0xff] }
  0x30   :  { %563 = vmatprep.subr.bf16.mxu1 %v719_v0  ;;  %578 = vmatpush3.bf16.msra.mxu0 %v634_v13  ;;  %v510_v53 = vld [vmem:[%s885_s8] ss:$0 sm:$0xff] }
  0x31   :  { %579 = vmatprep.subr.bf16.mxu0 %v719_v0 }
  0x33   :  { %564 = vmatpush3.bf16.msra.mxu1 %v629_v8 }
  0x34   :  { %565 = vmatprep.subr.bf16.mxu1 %v719_v0  ;;  %580 = vmatpush3.bf16.msra.mxu0 %v635_v14 }
  0x35   :  { %581 = vmatprep.subr.bf16.mxu0 %v719_v0 }
  0x37   :  { %566 = vmatpush3.bf16.msra.mxu1 %v630_v9 }
  0x38   :  { %567 = vmatprep.subr.bf16.mxu1 %v719_v0  ;;  %582 = vmatpush3.bf16.msra.mxu0 %v636_v15 }
  0x39   :  { %583 = vmatprep.subr.bf16.mxu0 %v719_v0 }
  0x3b   :  { %568 = vmatpush3.bf16.msra.mxu1 %v631_v10 }
  0x3c   :  { %569 = vmatprep.subr.bf16.mxu1 %v719_v0  ;;  %584 = vmatpush3.bf16.msra.mxu0 %v637_v16 }
  0x3d   :  { %585 = vmatprep.subr.bf16.mxu0 %v719_v0 }
  0x3f   :  { %570 = vmatpush3.bf16.msra.mxu1 %v632_v11 }
  0x40   :  { %571 = vmatprep.subr.bf16.mxu1 %v719_v0  ;;  %586 = vmatpush3.bf16.msra.mxu0 %v638_v17 }
  0x41   :  { %587 = vmatprep.subr.bf16.mxu0 %v719_v0 }
  0x43   :  { %572 = vmatpush3.bf16.msra.mxu1 %v633_v12 }
  0x44   :  { %597 = vmatprep.subr.bf16.mxu1 %v719_v0  ;;  %588 = vmatpush3.bf16.msra.mxu0 %v639_v18 }
  0x45   :  { %589 = vmatprep.subr.bf16.mxu0 %v719_v0 }
  0x48   :  { %590 = vmatpush3.bf16.msra.mxu0 %v640_v27 }
  0x49   :  { %591 = vmatprep.subr.bf16.mxu0 %v719_v0 }
  0x4c   :  { %592 = vmatpush3.bf16.msra.mxu0 %v641_v28 }
  0xee   :  { %v135_v20 = vpop.f32.mrf.mxu0 }
  0xef   :  { %v136_v21 = vadd.f32 %v488_v19, %v135_v20 }
  0xf0   :  { %v555_v22 = vpop.f32.mrf.mxu0 }
  0xf1   :  { %v141_v23 = vmax.f32 %v136_v21, 0.0 }
  0xf2   :  { %v138_v24 = vpop.f32.mrf.mxu0 }
  0xf3   :  { %v142_v25 = vpack.c.bf16 %v141_v23, %v141_v23 }
  0xf4   :  { %v556_v26 = vpop.f32.mrf.mxu0 }
  0xf5   :  { %574 = vmatmul.mubr.bf16.vlgmr.msra.gmra.mxu1 %v142_v25 }
  0xf6   :  { %613 = vmatprep.mubr.msk.bf16.mxu1 %vm720_vm0, %v719_v0  ;;  %598 = vmatpush3.bf16.msra.mxu1 %v642_v29 }
  0xf7   :  { %599 = vmatprep.subr.bf16.mxu1 %v719_v0 }
  0xfa   :  { %600 = vmatpush3.bf16.msra.mxu1 %v643_v30 }
  0xfb   :  { %601 = vmatprep.subr.bf16.mxu1 %v719_v0 }
  0xfe   :  { %602 = vmatpush3.bf16.msra.mxu1 %v644_v31 }
  0xff   :  { %603 = vmatprep.subr.bf16.mxu1 %v719_v0 }
 0x102   :  { %604 = vmatpush3.bf16.msra.mxu1 %v645_v32 }
 0x103   :  { %605 = vmatprep.subr.bf16.mxu1 %v719_v0 }
 0x106   :  { %606 = vmatpush3.bf16.msra.mxu1 %v646_v33 }
 0x107   :  { %607 = vmatprep.subr.bf16.mxu1 %v719_v0 }
 0x10a   :  { %608 = vmatpush3.bf16.msra.mxu1 %v647_v34 }
 0x10b   :  { %609 = vmatprep.subr.bf16.mxu1 %v719_v0 }
 0x10e   :  { %610 = vmatpush3.bf16.msra.mxu1 %v648_v43 }
 0x10f   :  { %611 = vmatprep.subr.bf16.mxu1 %v719_v0 }
 0x112   :  { %612 = vmatpush3.bf16.msra.mxu1 %v649_v44 }
 0x1b5   :  { %v248_v36 = vpop.f32.mrf.mxu1 }
 0x1b6   :  { %v249_v37 = vadd.f32 %v492_v35, %v248_v36 }
 0x1b7   :  { %v575_v38 = vpop.f32.mrf.mxu1 }
 0x1b8   :  { %v254_v39 = vmax.f32 %v249_v37, 0.0 }
 0x1b9   :  { %v251_v40 = vpop.f32.mrf.mxu1 }
 0x1ba   :  { %v255_v41 = vpack.c.bf16 %v254_v39, %v254_v39 }
 0x1bb   :  { %v576_v42 = vpop.f32.mrf.mxu1 }
 0x1bc   :  { %594 = vmatmul.mubr.bf16.vlgmr.msra.gmra.mxu0 %v255_v41 }
 0x27c   :  { %v361_v46 = vpop.f32.mrf.mxu0 }
 0x27d   :  { %v362_v47 = vadd.f32 %v501_v45, %v361_v46 }
 0x27e   :  { %v595_v48 = vpop.f32.mrf.mxu0 }
 0x27f   :  { %v367_v49 = vmax.f32 %v362_v47, 0.0 }
 0x280   :  { %v364_v50 = vpop.f32.mrf.mxu0 }
 0x281   :  { %v368_v51 = vpack.c.bf16 %v367_v49, %v367_v49 }
 0x282   :  { %v596_v52 = vpop.f32.mrf.mxu0 }
 0x283   :  { %614 = vmatmul.mubr.bf16.vlgmr.msra.gmra.mxu1 %v368_v51 }
 0x343   :  { %v474_v54 = vpop.f32.mrf.mxu1 }
 0x344   :  { %v475_v55 = vadd.f32 %v510_v53, %v474_v54 }
 0x345   :  { %v615_v56 = vpop.f32.mrf.mxu1 }
 0x346   :  { %481 = vst.msk [vmem:[%s886_s9] sm:$0xff] %vm480_vm2, %v475_v55 }
 0x347   :  { %v477_v57 = vpop.f32.mrf.mxu1 }
 0x349   :  { %v616_v58 = vpop.f32.mrf.mxu1 }
 0x34a   :  { %486 = vsyncpa [#allocation3], 1 }
 0x34b   :  { %487 = vsyncpa [#allocation5], 1 }

</bundles_post_ra>
